<compile_context>
chip_gen: v5e
topology: v5e:2x2
jax: 0.10.0
libtpu: 0.0.40
codegen_flags: <defaults>
</compile_context>

<pallas_src>
import jax
import jax.numpy as jnp
from jax import lax
from jax.experimental import pallas as pl
from jax.experimental.pallas import tpu as pltpu

# --- module hyper-parameters (synthetic, small) ---
PRIMITIVES = ["none", "max_pool_3x3", "avg_pool_3x3", "skip_connect",
              "sep_conv_3x3", "sep_conv_5x5", "dil_conv_3x3", "dil_conv_5x5"]
NUM_NODES = 2                                   # args.num_nodes
NUM_OPS = len(PRIMITIVES)                       # 8
HID = 32                                        # args.controller_hid
NUM_BLOCKS = sum(1 for i in range(NUM_NODES) for _ in range(2 + i)) * 2  # 10


def _controller_kernel(wib_ref, w_hh_ref, wdec_ref, bdec_ref, out_ref,
                       h_hist_ref):
    """Whole sequential LSTM recurrence + deferred batched decode, one call."""
    H = w_hh_ref.shape[0]
    nb, nops = out_ref.shape

    # Loop-invariant loads, hoisted out of the unrolled step loop.
    wib = wib_ref[...]             # (2, 4H) f32: row 0 = w_ih^T, row 1 = bias
    w_ih = wib[0:1, :]             # (1, 4H)
    bias = wib[1:2, :]             # (1, 4H)
    w_hh = w_hh_ref[...]           # (H, 4H) bf16

    # h / c live in f32 vregs across the whole unrolled recurrence.
    h = jnp.zeros((1, H), jnp.float32)
    c = jnp.zeros((1, H), jnp.float32)

    # Statically unrolled sequential recurrence (trip count is a Python const
    # 10, tiny live set -> full unroll gives the scheduler cross-step
    # visibility).
    for idx in range(nb):
        # torch forward feeds zeros at step 0, then float(idx) afterwards.
        x = float(idx)
        # Single-pass bf16 MXU matmul with f32 accumulation.
        gates = (x * w_ih + bias
                 + jnp.dot(h.astype(jnp.bfloat16), w_hh,
                           preferred_element_type=jnp.float32))   # (1, 4H)
        # sigmoid(g) == 0.5*(tanh(0.5*g)+1): one EUP op + cheap VALU ops;
        # the two tanh calls are independent and pipeline in the EUP slot.
        sig_all = 0.5 * (jnp.tanh(0.5 * gates) + 1.0)
        tanh_all = jnp.tanh(gates)
        i_g = sig_all[:, 0:H]
        f_g = sig_all[:, H:2 * H]
        o_g = sig_all[:, 3 * H:4 * H]
        g_g = tanh_all[:, 2 * H:3 * H]
        c = f_g * c + i_g * g_g
        h = o_g * jnp.tanh(c)
        # Record h_t with a static row store into VMEM scratch (vst slot,
        # off the h/c serial chain).
        h_hist_ref[pl.ds(idx, 1), :] = h

    # Deferred decode: one (nb,H)@(H,nb*nops) bf16 matmul, pick the
    # block-diagonal (step i uses decoder i) via an in-kernel iota mask +
    # 0/1 selection matmul, single full-tile bias add, single store.
    h_all = h_hist_ref[...]                                      # (nb, H)
    full = jnp.dot(h_all.astype(jnp.bfloat16), wdec_ref[...],
                   preferred_element_type=jnp.float32)           # (nb, nb*nops)

    col = lax.broadcasted_iota(jnp.int32, (nb, nb * nops), 1)
    row = lax.broadcasted_iota(jnp.int32, (nb, nb * nops), 0)
    blk = row * nops
    diag = jnp.logical_and(col >= blk, col < blk + nops)
    masked = jnp.where(diag, full, jnp.float32(0.0))

    # 0/1 selection matrix built in-kernel: column k -> op (k % nops).
    k_mod = lax.broadcasted_iota(jnp.int32, (nb * nops, nops), 0) % nops
    o_ids = lax.broadcasted_iota(jnp.int32, (nb * nops, nops), 1)
    sel = (k_mod == o_ids).astype(jnp.bfloat16)                  # (nb*nops, nops)

    logits = jnp.dot(masked.astype(jnp.bfloat16), sel,
                     preferred_element_type=jnp.float32)         # (nb, nops)
    out_ref[...] = logits + bdec_ref[...]


def lstm_controller_forward(w_ih_t, w_hh_t, b, wdec_t, bdec):
    """Wrapper: whole-array blocks in VMEM, no grid (tiny sequential problem)."""
    num_blocks, hid, num_ops = wdec_t.shape

    # Fuse w_ih and bias into one input (fewer tiny HBM->VMEM DMAs).
    wib = jnp.concatenate([w_ih_t, b], axis=0)                   # (2, 4H) f32
    # bf16 MXU operands (single-pass matmuls); accumulation stays f32.
    w_hh_bf = w_hh_t.astype(jnp.bfloat16)                        # (H, 4H)
    # Lane-dense flattened decoder weights: column block j holds decoder j.
    wdec_flat = jnp.transpose(wdec_t, (1, 0, 2)).reshape(
        hid, num_blocks * num_ops).astype(jnp.bfloat16)          # (H, nb*nops)

    vmem = pl.BlockSpec(memory_space=pltpu.MemorySpace.VMEM)
    out = pl.pallas_call(
        _controller_kernel,
        out_shape=jax.ShapeDtypeStruct((num_blocks, num_ops), jnp.float32),
        in_specs=[vmem] * 4,
        out_specs=vmem,
        scratch_shapes=[pltpu.VMEM((num_blocks, hid), jnp.float32)],
    )(wib, w_hh_bf, wdec_flat, bdec)

    half = num_blocks // 2
    # forward() returns [first half, second half] of the concatenated logits.
    return [out[:half], out[half:]]


def reference_forward(w_ih_t, w_hh_t, b, wdec_t, bdec):
    """Pure-JAX f32 reference for correctness check (mirrors torch forward)."""
    H = w_hh_t.shape[0]
    h = jnp.zeros((1, H), jnp.float32)
    c = jnp.zeros((1, H), jnp.float32)
    rows = []
    for idx in range(wdec_t.shape[0]):
        x = jnp.float32(idx)
        gates = x * w_ih_t + h @ w_hh_t + b
        i = jax.nn.sigmoid(gates[:, :H])
        f = jax.nn.sigmoid(gates[:, H:2 * H])
        g = jnp.tanh(gates[:, 2 * H:3 * H])
        o = jax.nn.sigmoid(gates[:, 3 * H:])
        c = f * c + i * g
        h = o * jnp.tanh(c)
        rows.append(h @ wdec_t[idx] + bdec[idx][None, :])
    return jnp.concatenate(rows, axis=0)


if __name__ == "__main__":
    key = jax.random.PRNGKey(0)
    k_ih, k_hh, k_bih, k_bhh, k_dec = jax.random.split(key, 5)
    init_range = 0.1

    # torch param shapes: weight_ih (4H,1), weight_hh (4H,H), bias_ih/bias_hh (4H,)
    weight_ih = jax.random.uniform(k_ih, (4 * HID, 1), jnp.float32,
                                   -init_range, init_range)
    weight_hh = jax.random.uniform(k_hh, (4 * HID, HID), jnp.float32,
                                   -init_range, init_range)
    bias_ih = jax.random.uniform(k_bih, (4 * HID,), jnp.float32,
                                 -init_range, init_range)
    bias_hh = jax.random.uniform(k_bhh, (4 * HID,), jnp.float32,
                                 -init_range, init_range)
    # decoders: weight (num_ops, H), bias filled with 0 (reset_parameters)
    dec_w = jax.random.uniform(k_dec, (NUM_BLOCKS, NUM_OPS, HID), jnp.float32,
                               -init_range, init_range)
    dec_b = jnp.zeros((NUM_BLOCKS, NUM_OPS), jnp.float32)

    # kernel layout (pre-transposed)
    w_ih_t = weight_ih.T                          # (1, 4H)
    w_hh_t = weight_hh.T                          # (H, 4H)
    b = (bias_ih + bias_hh)[None, :]              # (1, 4H)
    wdec_t = jnp.transpose(dec_w, (0, 2, 1))      # (num_blocks, H, num_ops)

    result = lstm_controller_forward(w_ih_t, w_hh_t, b, wdec_t, dec_b)
    jax.block_until_ready(result)

    ref = reference_forward(w_ih_t, w_hh_t, b, wdec_t, dec_b)
    got = jnp.concatenate(result, axis=0)
    assert got.shape == (NUM_BLOCKS, NUM_OPS)
    assert result[0].shape == (NUM_BLOCKS // 2, NUM_OPS)
    assert result[1].shape == (NUM_BLOCKS // 2, NUM_OPS)
    # bf16 MXU operands in the kernel -> relaxed tolerance vs pure-f32 reference.
    assert jnp.allclose(got, ref, atol=3e-2, rtol=3e-2)

    print("KERNEL_OK")
</pallas_src>

<mosaic_0001>
module attributes {stable_mosaic.version = 11 : i64} {
  func.func @_controller_kernel(%arg0: memref<2x128xf32, #tpu.memory_space<vmem>>, %arg1: memref<32x128xbf16, #tpu.memory_space<vmem>>, %arg2: memref<32x80xbf16, #tpu.memory_space<vmem>>, %arg3: memref<10x8xf32, #tpu.memory_space<vmem>>, %arg4: memref<10x8xf32, #tpu.memory_space<vmem>>, %arg5: memref<10x32xf32, #tpu.memory_space<vmem>>) attributes {dimension_semantics = [], scalar_prefetch = 0 : i64, scratch_operands = 1 : i64, tpu.core_type = #tpu.core_type<tc>} {
    %c0 = arith.constant 0 : index
    %c0_0 = arith.constant 0 : index
    %0 = vector.load %arg0[%c0, %c0_0] : memref<2x128xf32, #tpu.memory_space<vmem>>, vector<2x128xf32>
    %1 = vector.extract_strided_slice %0 {offsets = [0, 0], sizes = [1, 128], strides = [1, 1]} : vector<2x128xf32> to vector<1x128xf32>
    %2 = vector.extract_strided_slice %0 {offsets = [1, 0], sizes = [1, 128], strides = [1, 1]} : vector<2x128xf32> to vector<1x128xf32>
    %c0_1 = arith.constant 0 : index
    %c0_2 = arith.constant 0 : index
    %3 = vector.load %arg1[%c0_1, %c0_2] : memref<32x128xbf16, #tpu.memory_space<vmem>>, vector<32x128xbf16>
    %cst = arith.constant 0.000000e+00 : f32
    %4 = vector.broadcast %cst : f32 to vector<1x32xf32>
    %cst_3 = arith.constant 0.000000e+00 : f32
    %5 = vector.broadcast %cst_3 : f32 to vector<1x32xf32>
    %cst_4 = arith.constant 0.000000e+00 : f32
    %6 = vector.broadcast %cst_4 : f32 to vector<1x128xf32>
    %7 = arith.mulf %6, %1 : vector<1x128xf32>
    %8 = arith.addf %7, %2 : vector<1x128xf32>
    %9 = arith.truncf %4 : vector<1x32xf32> to vector<1x32xbf16>
    %cst_5 = arith.constant dense<0.000000e+00> : vector<1x128xf32>
    %10 = tpu.matmul %9, %3, %cst_5 {dimension_numbers = #tpu.dot_dimension_numbers<[1], [0], [0], [1], [0, 0, 1, 1], [], []>} : vector<1x32xbf16>, vector<32x128xbf16>, vector<1x128xf32> -> vector<1x128xf32>
    %11 = arith.addf %8, %10 : vector<1x128xf32>
    %cst_6 = arith.constant 5.000000e-01 : f32
    %12 = vector.broadcast %cst_6 : f32 to vector<1x128xf32>
    %13 = arith.mulf %12, %11 : vector<1x128xf32>
    %14 = math.tanh %13 : vector<1x128xf32>
    %cst_7 = arith.constant 1.000000e+00 : f32
    %15 = vector.broadcast %cst_7 : f32 to vector<1x128xf32>
    %16 = arith.addf %14, %15 : vector<1x128xf32>
    %cst_8 = arith.constant 5.000000e-01 : f32
    %17 = vector.broadcast %cst_8 : f32 to vector<1x128xf32>
    %18 = arith.mulf %17, %16 : vector<1x128xf32>
    %19 = math.tanh %11 : vector<1x128xf32>
    %20 = vector.extract_strided_slice %18 {offsets = [0, 0], sizes = [1, 32], strides = [1, 1]} : vector<1x128xf32> to vector<1x32xf32>
    %21 = vector.extract_strided_slice %18 {offsets = [0, 32], sizes = [1, 32], strides = [1, 1]} : vector<1x128xf32> to vector<1x32xf32>
    %22 = vector.extract_strided_slice %18 {offsets = [0, 96], sizes = [1, 32], strides = [1, 1]} : vector<1x128xf32> to vector<1x32xf32>
    %23 = vector.extract_strided_slice %19 {offsets = [0, 64], sizes = [1, 32], strides = [1, 1]} : vector<1x128xf32> to vector<1x32xf32>
    %24 = arith.mulf %21, %5 : vector<1x32xf32>
    %25 = arith.mulf %20, %23 : vector<1x32xf32>
    %26 = arith.addf %24, %25 : vector<1x32xf32>
    %27 = math.tanh %26 : vector<1x32xf32>
    %28 = arith.mulf %22, %27 : vector<1x32xf32>
    %c0_9 = arith.constant 0 : index
    %c0_10 = arith.constant 0 : index
    %29 = vector.load %arg5[%c0_9, %c0_10] : memref<10x32xf32, #tpu.memory_space<vmem>>, vector<1x32xf32>
    tpu.vector_store %arg5[%c0_9, %c0_10], %28 {strides = array<i32>} : memref<10x32xf32, #tpu.memory_space<vmem>>, vector<1x32xf32>,
    %cst_11 = arith.constant 1.000000e+00 : f32
    %30 = vector.broadcast %cst_11 : f32 to vector<1x128xf32>
    %31 = arith.mulf %30, %1 : vector<1x128xf32>
    %32 = arith.addf %31, %2 : vector<1x128xf32>
    %33 = arith.truncf %28 : vector<1x32xf32> to vector<1x32xbf16>
    %cst_12 = arith.constant dense<0.000000e+00> : vector<1x128xf32>
    %34 = tpu.matmul %33, %3, %cst_12 {dimension_numbers = #tpu.dot_dimension_numbers<[1], [0], [0], [1], [0, 0, 1, 1], [], []>} : vector<1x32xbf16>, vector<32x128xbf16>, vector<1x128xf32> -> vector<1x128xf32>
    %35 = arith.addf %32, %34 : vector<1x128xf32>
    %cst_13 = arith.constant 5.000000e-01 : f32
    %36 = vector.broadcast %cst_13 : f32 to vector<1x128xf32>
    %37 = arith.mulf %36, %35 : vector<1x128xf32>
    %38 = math.tanh %37 : vector<1x128xf32>
    %cst_14 = arith.constant 1.000000e+00 : f32
    %39 = vector.broadcast %cst_14 : f32 to vector<1x128xf32>
    %40 = arith.addf %38, %39 : vector<1x128xf32>
    %cst_15 = arith.constant 5.000000e-01 : f32
    %41 = vector.broadcast %cst_15 : f32 to vector<1x128xf32>
    %42 = arith.mulf %41, %40 : vector<1x128xf32>
    %43 = math.tanh %35 : vector<1x128xf32>
    %44 = vector.extract_strided_slice %42 {offsets = [0, 0], sizes = [1, 32], strides = [1, 1]} : vector<1x128xf32> to vector<1x32xf32>
    %45 = vector.extract_strided_slice %42 {offsets = [0, 32], sizes = [1, 32], strides = [1, 1]} : vector<1x128xf32> to vector<1x32xf32>
    %46 = vector.extract_strided_slice %42 {offsets = [0, 96], sizes = [1, 32], strides = [1, 1]} : vector<1x128xf32> to vector<1x32xf32>
    %47 = vector.extract_strided_slice %43 {offsets = [0, 64], sizes = [1, 32], strides = [1, 1]} : vector<1x128xf32> to vector<1x32xf32>
    %48 = arith.mulf %45, %26 : vector<1x32xf32>
    %49 = arith.mulf %44, %47 : vector<1x32xf32>
    %50 = arith.addf %48, %49 : vector<1x32xf32>
    %51 = math.tanh %50 : vector<1x32xf32>
    %52 = arith.mulf %46, %51 : vector<1x32xf32>
    %c1 = arith.constant 1 : index
    %c0_16 = arith.constant 0 : index
    %53 = vector.load %arg5[%c1, %c0_16] : memref<10x32xf32, #tpu.memory_space<vmem>>, vector<1x32xf32>
    tpu.vector_store %arg5[%c1, %c0_16], %52 {strides = array<i32>} : memref<10x32xf32, #tpu.memory_space<vmem>>, vector<1x32xf32>,
    %cst_17 = arith.constant 2.000000e+00 : f32
    %54 = vector.broadcast %cst_17 : f32 to vector<1x128xf32>
    %55 = arith.mulf %54, %1 : vector<1x128xf32>
    %56 = arith.addf %55, %2 : vector<1x128xf32>
    %57 = arith.truncf %52 : vector<1x32xf32> to vector<1x32xbf16>
    %cst_18 = arith.constant dense<0.000000e+00> : vector<1x128xf32>
    %58 = tpu.matmul %57, %3, %cst_18 {dimension_numbers = #tpu.dot_dimension_numbers<[1], [0], [0], [1], [0, 0, 1, 1], [], []>} : vector<1x32xbf16>, vector<32x128xbf16>, vector<1x128xf32> -> vector<1x128xf32>
    %59 = arith.addf %56, %58 : vector<1x128xf32>
    %cst_19 = arith.constant 5.000000e-01 : f32
    %60 = vector.broadcast %cst_19 : f32 to vector<1x128xf32>
    %61 = arith.mulf %60, %59 : vector<1x128xf32>
    %62 = math.tanh %61 : vector<1x128xf32>
    %cst_20 = arith.constant 1.000000e+00 : f32
    %63 = vector.broadcast %cst_20 : f32 to vector<1x128xf32>
    %64 = arith.addf %62, %63 : vector<1x128xf32>
    %cst_21 = arith.constant 5.000000e-01 : f32
    %65 = vector.broadcast %cst_21 : f32 to vector<1x128xf32>
    %66 = arith.mulf %65, %64 : vector<1x128xf32>
    %67 = math.tanh %59 : vector<1x128xf32>
    %68 = vector.extract_strided_slice %66 {offsets = [0, 0], sizes = [1, 32], strides = [1, 1]} : vector<1x128xf32> to vector<1x32xf32>
    %69 = vector.extract_strided_slice %66 {offsets = [0, 32], sizes = [1, 32], strides = [1, 1]} : vector<1x128xf32> to vector<1x32xf32>
    %70 = vector.extract_strided_slice %66 {offsets = [0, 96], sizes = [1, 32], strides = [1, 1]} : vector<1x128xf32> to vector<1x32xf32>
    %71 = vector.extract_strided_slice %67 {offsets = [0, 64], sizes = [1, 32], strides = [1, 1]} : vector<1x128xf32> to vector<1x32xf32>
    %72 = arith.mulf %69, %50 : vector<1x32xf32>
    %73 = arith.mulf %68, %71 : vector<1x32xf32>
    %74 = arith.addf %72, %73 : vector<1x32xf32>
    %75 = math.tanh %74 : vector<1x32xf32>
    %76 = arith.mulf %70, %75 : vector<1x32xf32>
    %c2 = arith.constant 2 : index
    %c0_22 = arith.constant 0 : index
    %77 = vector.load %arg5[%c2, %c0_22] : memref<10x32xf32, #tpu.memory_space<vmem>>, vector<1x32xf32>
    tpu.vector_store %arg5[%c2, %c0_22], %76 {strides = array<i32>} : memref<10x32xf32, #tpu.memory_space<vmem>>, vector<1x32xf32>,
    %cst_23 = arith.constant 3.000000e+00 : f32
    %78 = vector.broadcast %cst_23 : f32 to vector<1x128xf32>
    %79 = arith.mulf %78, %1 : vector<1x128xf32>
    %80 = arith.addf %79, %2 : vector<1x128xf32>
    %81 = arith.truncf %76 : vector<1x32xf32> to vector<1x32xbf16>
    %cst_24 = arith.constant dense<0.000000e+00> : vector<1x128xf32>
    %82 = tpu.matmul %81, %3, %cst_24 {dimension_numbers = #tpu.dot_dimension_numbers<[1], [0], [0], [1], [0, 0, 1, 1], [], []>} : vector<1x32xbf16>, vector<32x128xbf16>, vector<1x128xf32> -> vector<1x128xf32>
    %83 = arith.addf %80, %82 : vector<1x128xf32>
    %cst_25 = arith.constant 5.000000e-01 : f32
    %84 = vector.broadcast %cst_25 : f32 to vector<1x128xf32>
    %85 = arith.mulf %84, %83 : vector<1x128xf32>
    %86 = math.tanh %85 : vector<1x128xf32>
    %cst_26 = arith.constant 1.000000e+00 : f32
    %87 = vector.broadcast %cst_26 : f32 to vector<1x128xf32>
    %88 = arith.addf %86, %87 : vector<1x128xf32>
    %cst_27 = arith.constant 5.000000e-01 : f32
    %89 = vector.broadcast %cst_27 : f32 to vector<1x128xf32>
    %90 = arith.mulf %89, %88 : vector<1x128xf32>
    %91 = math.tanh %83 : vector<1x128xf32>
    %92 = vector.extract_strided_slice %90 {offsets = [0, 0], sizes = [1, 32], strides = [1, 1]} : vector<1x128xf32> to vector<1x32xf32>
    %93 = vector.extract_strided_slice %90 {offsets = [0, 32], sizes = [1, 32], strides = [1, 1]} : vector<1x128xf32> to vector<1x32xf32>
    %94 = vector.extract_strided_slice %90 {offsets = [0, 96], sizes = [1, 32], strides = [1, 1]} : vector<1x128xf32> to vector<1x32xf32>
    %95 = vector.extract_strided_slice %91 {offsets = [0, 64], sizes = [1, 32], strides = [1, 1]} : vector<1x128xf32> to vector<1x32xf32>
    %96 = arith.mulf %93, %74 : vector<1x32xf32>
    %97 = arith.mulf %92, %95 : vector<1x32xf32>
    %98 = arith.addf %96, %97 : vector<1x32xf32>
    %99 = math.tanh %98 : vector<1x32xf32>
    %100 = arith.mulf %94, %99 : vector<1x32xf32>
    %c3 = arith.constant 3 : index
    %c0_28 = arith.constant 0 : index
    %101 = vector.load %arg5[%c3, %c0_28] : memref<10x32xf32, #tpu.memory_space<vmem>>, vector<1x32xf32>
    tpu.vector_store %arg5[%c3, %c0_28], %100 {strides = array<i32>} : memref<10x32xf32, #tpu.memory_space<vmem>>, vector<1x32xf32>,
    %cst_29 = arith.constant 4.000000e+00 : f32
    %102 = vector.broadcast %cst_29 : f32 to vector<1x128xf32>
    %103 = arith.mulf %102, %1 : vector<1x128xf32>
    %104 = arith.addf %103, %2 : vector<1x128xf32>
    %105 = arith.truncf %100 : vector<1x32xf32> to vector<1x32xbf16>
    %cst_30 = arith.constant dense<0.000000e+00> : vector<1x128xf32>
    %106 = tpu.matmul %105, %3, %cst_30 {dimension_numbers = #tpu.dot_dimension_numbers<[1], [0], [0], [1], [0, 0, 1, 1], [], []>} : vector<1x32xbf16>, vector<32x128xbf16>, vector<1x128xf32> -> vector<1x128xf32>
    %107 = arith.addf %104, %106 : vector<1x128xf32>
    %cst_31 = arith.constant 5.000000e-01 : f32
    %108 = vector.broadcast %cst_31 : f32 to vector<1x128xf32>
    %109 = arith.mulf %108, %107 : vector<1x128xf32>
    %110 = math.tanh %109 : vector<1x128xf32>
    %cst_32 = arith.constant 1.000000e+00 : f32
    %111 = vector.broadcast %cst_32 : f32 to vector<1x128xf32>
    %112 = arith.addf %110, %111 : vector<1x128xf32>
    %cst_33 = arith.constant 5.000000e-01 : f32
    %113 = vector.broadcast %cst_33 : f32 to vector<1x128xf32>
    %114 = arith.mulf %113, %112 : vector<1x128xf32>
    %115 = math.tanh %107 : vector<1x128xf32>
    %116 = vector.extract_strided_slice %114 {offsets = [0, 0], sizes = [1, 32], strides = [1, 1]} : vector<1x128xf32> to vector<1x32xf32>
    %117 = vector.extract_strided_slice %114 {offsets = [0, 32], sizes = [1, 32], strides = [1, 1]} : vector<1x128xf32> to vector<1x32xf32>
    %118 = vector.extract_strided_slice %114 {offsets = [0, 96], sizes = [1, 32], strides = [1, 1]} : vector<1x128xf32> to vector<1x32xf32>
    %119 = vector.extract_strided_slice %115 {offsets = [0, 64], sizes = [1, 32], strides = [1, 1]} : vector<1x128xf32> to vector<1x32xf32>
    %120 = arith.mulf %117, %98 : vector<1x32xf32>
    %121 = arith.mulf %116, %119 : vector<1x32xf32>
    %122 = arith.addf %120, %121 : vector<1x32xf32>
    %123 = math.tanh %122 : vector<1x32xf32>
    %124 = arith.mulf %118, %123 : vector<1x32xf32>
    %c4 = arith.constant 4 : index
    %c0_34 = arith.constant 0 : index
    %125 = vector.load %arg5[%c4, %c0_34] : memref<10x32xf32, #tpu.memory_space<vmem>>, vector<1x32xf32>
    tpu.vector_store %arg5[%c4, %c0_34], %124 {strides = array<i32>} : memref<10x32xf32, #tpu.memory_space<vmem>>, vector<1x32xf32>,
    %cst_35 = arith.constant 5.000000e+00 : f32
    %126 = vector.broadcast %cst_35 : f32 to vector<1x128xf32>
    %127 = arith.mulf %126, %1 : vector<1x128xf32>
    %128 = arith.addf %127, %2 : vector<1x128xf32>
    %129 = arith.truncf %124 : vector<1x32xf32> to vector<1x32xbf16>
    %cst_36 = arith.constant dense<0.000000e+00> : vector<1x128xf32>
    %130 = tpu.matmul %129, %3, %cst_36 {dimension_numbers = #tpu.dot_dimension_numbers<[1], [0], [0], [1], [0, 0, 1, 1], [], []>} : vector<1x32xbf16>, vector<32x128xbf16>, vector<1x128xf32> -> vector<1x128xf32>
    %131 = arith.addf %128, %130 : vector<1x128xf32>
    %cst_37 = arith.constant 5.000000e-01 : f32
    %132 = vector.broadcast %cst_37 : f32 to vector<1x128xf32>
    %133 = arith.mulf %132, %131 : vector<1x128xf32>
    %134 = math.tanh %133 : vector<1x128xf32>
    %cst_38 = arith.constant 1.000000e+00 : f32
    %135 = vector.broadcast %cst_38 : f32 to vector<1x128xf32>
    %136 = arith.addf %134, %135 : vector<1x128xf32>
    %cst_39 = arith.constant 5.000000e-01 : f32
    %137 = vector.broadcast %cst_39 : f32 to vector<1x128xf32>
    %138 = arith.mulf %137, %136 : vector<1x128xf32>
    %139 = math.tanh %131 : vector<1x128xf32>
    %140 = vector.extract_strided_slice %138 {offsets = [0, 0], sizes = [1, 32], strides = [1, 1]} : vector<1x128xf32> to vector<1x32xf32>
    %141 = vector.extract_strided_slice %138 {offsets = [0, 32], sizes = [1, 32], strides = [1, 1]} : vector<1x128xf32> to vector<1x32xf32>
    %142 = vector.extract_strided_slice %138 {offsets = [0, 96], sizes = [1, 32], strides = [1, 1]} : vector<1x128xf32> to vector<1x32xf32>
    %143 = vector.extract_strided_slice %139 {offsets = [0, 64], sizes = [1, 32], strides = [1, 1]} : vector<1x128xf32> to vector<1x32xf32>
    %144 = arith.mulf %141, %122 : vector<1x32xf32>
    %145 = arith.mulf %140, %143 : vector<1x32xf32>
    %146 = arith.addf %144, %145 : vector<1x32xf32>
    %147 = math.tanh %146 : vector<1x32xf32>
    %148 = arith.mulf %142, %147 : vector<1x32xf32>
    %c5 = arith.constant 5 : index
    %c0_40 = arith.constant 0 : index
    %149 = vector.load %arg5[%c5, %c0_40] : memref<10x32xf32, #tpu.memory_space<vmem>>, vector<1x32xf32>
    tpu.vector_store %arg5[%c5, %c0_40], %148 {strides = array<i32>} : memref<10x32xf32, #tpu.memory_space<vmem>>, vector<1x32xf32>,
    %cst_41 = arith.constant 6.000000e+00 : f32
    %150 = vector.broadcast %cst_41 : f32 to vector<1x128xf32>
    %151 = arith.mulf %150, %1 : vector<1x128xf32>
    %152 = arith.addf %151, %2 : vector<1x128xf32>
    %153 = arith.truncf %148 : vector<1x32xf32> to vector<1x32xbf16>
    %cst_42 = arith.constant dense<0.000000e+00> : vector<1x128xf32>
    %154 = tpu.matmul %153, %3, %cst_42 {dimension_numbers = #tpu.dot_dimension_numbers<[1], [0], [0], [1], [0, 0, 1, 1], [], []>} : vector<1x32xbf16>, vector<32x128xbf16>, vector<1x128xf32> -> vector<1x128xf32>
    %155 = arith.addf %152, %154 : vector<1x128xf32>
    %cst_43 = arith.constant 5.000000e-01 : f32
    %156 = vector.broadcast %cst_43 : f32 to vector<1x128xf32>
    %157 = arith.mulf %156, %155 : vector<1x128xf32>
    %158 = math.tanh %157 : vector<1x128xf32>
    %cst_44 = arith.constant 1.000000e+00 : f32
    %159 = vector.broadcast %cst_44 : f32 to vector<1x128xf32>
    %160 = arith.addf %158, %159 : vector<1x128xf32>
    %cst_45 = arith.constant 5.000000e-01 : f32
    %161 = vector.broadcast %cst_45 : f32 to vector<1x128xf32>
    %162 = arith.mulf %161, %160 : vector<1x128xf32>
    %163 = math.tanh %155 : vector<1x128xf32>
    %164 = vector.extract_strided_slice %162 {offsets = [0, 0], sizes = [1, 32], strides = [1, 1]} : vector<1x128xf32> to vector<1x32xf32>
    %165 = vector.extract_strided_slice %162 {offsets = [0, 32], sizes = [1, 32], strides = [1, 1]} : vector<1x128xf32> to vector<1x32xf32>
    %166 = vector.extract_strided_slice %162 {offsets = [0, 96], sizes = [1, 32], strides = [1, 1]} : vector<1x128xf32> to vector<1x32xf32>
    %167 = vector.extract_strided_slice %163 {offsets = [0, 64], sizes = [1, 32], strides = [1, 1]} : vector<1x128xf32> to vector<1x32xf32>
    %168 = arith.mulf %165, %146 : vector<1x32xf32>
    %169 = arith.mulf %164, %167 : vector<1x32xf32>
    %170 = arith.addf %168, %169 : vector<1x32xf32>
    %171 = math.tanh %170 : vector<1x32xf32>
    %172 = arith.mulf %166, %171 : vector<1x32xf32>
    %c6 = arith.constant 6 : index
    %c0_46 = arith.constant 0 : index
    %173 = vector.load %arg5[%c6, %c0_46] : memref<10x32xf32, #tpu.memory_space<vmem>>, vector<1x32xf32>
    tpu.vector_store %arg5[%c6, %c0_46], %172 {strides = array<i32>} : memref<10x32xf32, #tpu.memory_space<vmem>>, vector<1x32xf32>,
    %cst_47 = arith.constant 7.000000e+00 : f32
    %174 = vector.broadcast %cst_47 : f32 to vector<1x128xf32>
    %175 = arith.mulf %174, %1 : vector<1x128xf32>
    %176 = arith.addf %175, %2 : vector<1x128xf32>
    %177 = arith.truncf %172 : vector<1x32xf32> to vector<1x32xbf16>
    %cst_48 = arith.constant dense<0.000000e+00> : vector<1x128xf32>
    %178 = tpu.matmul %177, %3, %cst_48 {dimension_numbers = #tpu.dot_dimension_numbers<[1], [0], [0], [1], [0, 0, 1, 1], [], []>} : vector<1x32xbf16>, vector<32x128xbf16>, vector<1x128xf32> -> vector<1x128xf32>
    %179 = arith.addf %176, %178 : vector<1x128xf32>
    %cst_49 = arith.constant 5.000000e-01 : f32
    %180 = vector.broadcast %cst_49 : f32 to vector<1x128xf32>
    %181 = arith.mulf %180, %179 : vector<1x128xf32>
    %182 = math.tanh %181 : vector<1x128xf32>
    %cst_50 = arith.constant 1.000000e+00 : f32
    %183 = vector.broadcast %cst_50 : f32 to vector<1x128xf32>
    %184 = arith.addf %182, %183 : vector<1x128xf32>
    %cst_51 = arith.constant 5.000000e-01 : f32
    %185 = vector.broadcast %cst_51 : f32 to vector<1x128xf32>
    %186 = arith.mulf %185, %184 : vector<1x128xf32>
    %187 = math.tanh %179 : vector<1x128xf32>
    %188 = vector.extract_strided_slice %186 {offsets = [0, 0], sizes = [1, 32], strides = [1, 1]} : vector<1x128xf32> to vector<1x32xf32>
    %189 = vector.extract_strided_slice %186 {offsets = [0, 32], sizes = [1, 32], strides = [1, 1]} : vector<1x128xf32> to vector<1x32xf32>
    %190 = vector.extract_strided_slice %186 {offsets = [0, 96], sizes = [1, 32], strides = [1, 1]} : vector<1x128xf32> to vector<1x32xf32>
    %191 = vector.extract_strided_slice %187 {offsets = [0, 64], sizes = [1, 32], strides = [1, 1]} : vector<1x128xf32> to vector<1x32xf32>
    %192 = arith.mulf %189, %170 : vector<1x32xf32>
    %193 = arith.mulf %188, %191 : vector<1x32xf32>
    %194 = arith.addf %192, %193 : vector<1x32xf32>
    %195 = math.tanh %194 : vector<1x32xf32>
    %196 = arith.mulf %190, %195 : vector<1x32xf32>
    %c7 = arith.constant 7 : index
    %c0_52 = arith.constant 0 : index
    %197 = vector.load %arg5[%c7, %c0_52] : memref<10x32xf32, #tpu.memory_space<vmem>>, vector<1x32xf32>
    tpu.vector_store %arg5[%c7, %c0_52], %196 {strides = array<i32>} : memref<10x32xf32, #tpu.memory_space<vmem>>, vector<1x32xf32>,
    %cst_53 = arith.constant 8.000000e+00 : f32
    %198 = vector.broadcast %cst_53 : f32 to vector<1x128xf32>
    %199 = arith.mulf %198, %1 : vector<1x128xf32>
    %200 = arith.addf %199, %2 : vector<1x128xf32>
    %201 = arith.truncf %196 : vector<1x32xf32> to vector<1x32xbf16>
    %cst_54 = arith.constant dense<0.000000e+00> : vector<1x128xf32>
    %202 = tpu.matmul %201, %3, %cst_54 {dimension_numbers = #tpu.dot_dimension_numbers<[1], [0], [0], [1], [0, 0, 1, 1], [], []>} : vector<1x32xbf16>, vector<32x128xbf16>, vector<1x128xf32> -> vector<1x128xf32>
    %203 = arith.addf %200, %202 : vector<1x128xf32>
    %cst_55 = arith.constant 5.000000e-01 : f32
    %204 = vector.broadcast %cst_55 : f32 to vector<1x128xf32>
    %205 = arith.mulf %204, %203 : vector<1x128xf32>
    %206 = math.tanh %205 : vector<1x128xf32>
    %cst_56 = arith.constant 1.000000e+00 : f32
    %207 = vector.broadcast %cst_56 : f32 to vector<1x128xf32>
    %208 = arith.addf %206, %207 : vector<1x128xf32>
    %cst_57 = arith.constant 5.000000e-01 : f32
    %209 = vector.broadcast %cst_57 : f32 to vector<1x128xf32>
    %210 = arith.mulf %209, %208 : vector<1x128xf32>
    %211 = math.tanh %203 : vector<1x128xf32>
    %212 = vector.extract_strided_slice %210 {offsets = [0, 0], sizes = [1, 32], strides = [1, 1]} : vector<1x128xf32> to vector<1x32xf32>
    %213 = vector.extract_strided_slice %210 {offsets = [0, 32], sizes = [1, 32], strides = [1, 1]} : vector<1x128xf32> to vector<1x32xf32>
    %214 = vector.extract_strided_slice %210 {offsets = [0, 96], sizes = [1, 32], strides = [1, 1]} : vector<1x128xf32> to vector<1x32xf32>
    %215 = vector.extract_strided_slice %211 {offsets = [0, 64], sizes = [1, 32], strides = [1, 1]} : vector<1x128xf32> to vector<1x32xf32>
    %216 = arith.mulf %213, %194 : vector<1x32xf32>
    %217 = arith.mulf %212, %215 : vector<1x32xf32>
    %218 = arith.addf %216, %217 : vector<1x32xf32>
    %219 = math.tanh %218 : vector<1x32xf32>
    %220 = arith.mulf %214, %219 : vector<1x32xf32>
    %c8 = arith.constant 8 : index
    %c0_58 = arith.constant 0 : index
    %221 = vector.load %arg5[%c8, %c0_58] : memref<10x32xf32, #tpu.memory_space<vmem>>, vector<1x32xf32>
    tpu.vector_store %arg5[%c8, %c0_58], %220 {strides = array<i32>} : memref<10x32xf32, #tpu.memory_space<vmem>>, vector<1x32xf32>,
    %cst_59 = arith.constant 9.000000e+00 : f32
    %222 = vector.broadcast %cst_59 : f32 to vector<1x128xf32>
    %223 = arith.mulf %222, %1 : vector<1x128xf32>
    %224 = arith.addf %223, %2 : vector<1x128xf32>
    %225 = arith.truncf %220 : vector<1x32xf32> to vector<1x32xbf16>
    %cst_60 = arith.constant dense<0.000000e+00> : vector<1x128xf32>
    %226 = tpu.matmul %225, %3, %cst_60 {dimension_numbers = #tpu.dot_dimension_numbers<[1], [0], [0], [1], [0, 0, 1, 1], [], []>} : vector<1x32xbf16>, vector<32x128xbf16>, vector<1x128xf32> -> vector<1x128xf32>
    %227 = arith.addf %224, %226 : vector<1x128xf32>
    %cst_61 = arith.constant 5.000000e-01 : f32
    %228 = vector.broadcast %cst_61 : f32 to vector<1x128xf32>
    %229 = arith.mulf %228, %227 : vector<1x128xf32>
    %230 = math.tanh %229 : vector<1x128xf32>
    %cst_62 = arith.constant 1.000000e+00 : f32
    %231 = vector.broadcast %cst_62 : f32 to vector<1x128xf32>
    %232 = arith.addf %230, %231 : vector<1x128xf32>
    %cst_63 = arith.constant 5.000000e-01 : f32
    %233 = vector.broadcast %cst_63 : f32 to vector<1x128xf32>
    %234 = arith.mulf %233, %232 : vector<1x128xf32>
    %235 = math.tanh %227 : vector<1x128xf32>
    %236 = vector.extract_strided_slice %234 {offsets = [0, 0], sizes = [1, 32], strides = [1, 1]} : vector<1x128xf32> to vector<1x32xf32>
    %237 = vector.extract_strided_slice %234 {offsets = [0, 32], sizes = [1, 32], strides = [1, 1]} : vector<1x128xf32> to vector<1x32xf32>
    %238 = vector.extract_strided_slice %234 {offsets = [0, 96], sizes = [1, 32], strides = [1, 1]} : vector<1x128xf32> to vector<1x32xf32>
    %239 = vector.extract_strided_slice %235 {offsets = [0, 64], sizes = [1, 32], strides = [1, 1]} : vector<1x128xf32> to vector<1x32xf32>
    %240 = arith.mulf %237, %218 : vector<1x32xf32>
    %241 = arith.mulf %236, %239 : vector<1x32xf32>
    %242 = arith.addf %240, %241 : vector<1x32xf32>
    %243 = math.tanh %242 : vector<1x32xf32>
    %244 = arith.mulf %238, %243 : vector<1x32xf32>
    %c9 = arith.constant 9 : index
    %c0_64 = arith.constant 0 : index
    %245 = vector.load %arg5[%c9, %c0_64] : memref<10x32xf32, #tpu.memory_space<vmem>>, vector<1x32xf32>
    tpu.vector_store %arg5[%c9, %c0_64], %244 {strides = array<i32>} : memref<10x32xf32, #tpu.memory_space<vmem>>, vector<1x32xf32>,
    %c0_65 = arith.constant 0 : index
    %c0_66 = arith.constant 0 : index
    %246 = vector.load %arg5[%c0_65, %c0_66] : memref<10x32xf32, #tpu.memory_space<vmem>>, vector<10x32xf32>
    %247 = arith.truncf %246 : vector<10x32xf32> to vector<10x32xbf16>
    %c0_67 = arith.constant 0 : index
    %c0_68 = arith.constant 0 : index
    %248 = vector.load %arg2[%c0_67, %c0_68] : memref<32x80xbf16, #tpu.memory_space<vmem>>, vector<32x80xbf16>
    %cst_69 = arith.constant dense<0.000000e+00> : vector<10x80xf32>
    %249 = tpu.matmul %247, %248, %cst_69 {dimension_numbers = #tpu.dot_dimension_numbers<[1], [0], [0], [1], [0, 0, 1, 1], [], []>} : vector<10x32xbf16>, vector<32x80xbf16>, vector<10x80xf32> -> vector<10x80xf32>
    %250 = tpu.iota {dimensions = array<i32: 1>} : vector<10x80xi32>
    %251 = tpu.iota {dimensions = array<i32: 0>} : vector<10x80xi32>
    %c8_i32 = arith.constant 8 : i32
    %252 = vector.broadcast %c8_i32 : i32 to vector<10x80xi32>
    %253 = arith.muli %251, %252 : vector<10x80xi32>
    %254 = arith.cmpi sge, %250, %253 : vector<10x80xi32>
    %c8_i32_70 = arith.constant 8 : i32
    %255 = vector.broadcast %c8_i32_70 : i32 to vector<10x80xi32>
    %256 = arith.addi %253, %255 : vector<10x80xi32>
    %257 = arith.cmpi slt, %250, %256 : vector<10x80xi32>
    %258 = arith.andi %254, %257 : vector<10x80xi1>
    %cst_71 = arith.constant 0.000000e+00 : f32
    %259 = vector.broadcast %cst_71 : f32 to vector<10x80xf32>
    %260 = arith.select %258, %249, %259 : vector<10x80xi1>, vector<10x80xf32>
    %261 = tpu.iota {dimensions = array<i32: 0>} : vector<80x8xi32>
    %c8_i32_72 = arith.constant 8 : i32
    %c0_i32 = arith.constant 0 : i32
    %262 = arith.cmpi eq, %c8_i32_72, %c0_i32 : i32
    %c1_i32 = arith.constant 1 : i32
    %263 = arith.select %262, %c1_i32, %c8_i32_72 : i32
    %264 = vector.broadcast %263 : i32 to vector<80x8xi32>
    %265 = arith.remsi %261, %264 : vector<80x8xi32>
    %c0_i32_73 = arith.constant 0 : i32
    %266 = vector.broadcast %c0_i32_73 : i32 to vector<80x8xi32>
    %267 = arith.cmpi ne, %265, %266 : vector<80x8xi32>
    %c0_i32_74 = arith.constant 0 : i32
    %268 = vector.broadcast %c0_i32_74 : i32 to vector<80x8xi32>
    %269 = arith.cmpi slt, %265, %268 : vector<80x8xi32>
    %c0_i32_75 = arith.constant 0 : i32
    %270 = arith.cmpi slt, %263, %c0_i32_75 : i32
    %271 = vector.broadcast %270 : i1 to vector<80x8xi1>
    %272 = vector.broadcast %271 : vector<80x8xi1> to vector<80x8xi1>
    %273 = arith.xori %269, %272 : vector<80x8xi1>
    %274 = arith.andi %273, %267 : vector<80x8xi1>
    %275 = vector.broadcast %263 : i32 to vector<80x8xi32>
    %276 = arith.addi %265, %275 : vector<80x8xi32>
    %277 = arith.select %274, %276, %265 : vector<80x8xi1>, vector<80x8xi32>
    %278 = tpu.iota {dimensions = array<i32: 1>} : vector<80x8xi32>
    %279 = arith.cmpi eq, %277, %278 : vector<80x8xi32>
    %280 = arith.extui %279 : vector<80x8xi1> to vector<80x8xi32>
    %281 = arith.sitofp %280 : vector<80x8xi32> to vector<80x8xf32>
    %282 = arith.truncf %281 : vector<80x8xf32> to vector<80x8xbf16>
    %283 = arith.truncf %260 : vector<10x80xf32> to vector<10x80xbf16>
    %cst_76 = arith.constant dense<0.000000e+00> : vector<10x8xf32>
    %284 = tpu.matmul %283, %282, %cst_76 {dimension_numbers = #tpu.dot_dimension_numbers<[1], [0], [0], [1], [0, 0, 1, 1], [], []>} : vector<10x80xbf16>, vector<80x8xbf16>, vector<10x8xf32> -> vector<10x8xf32>
    %c0_77 = arith.constant 0 : index
    %c0_78 = arith.constant 0 : index
    %285 = vector.load %arg3[%c0_77, %c0_78] : memref<10x8xf32, #tpu.memory_space<vmem>>, vector<10x8xf32>
    %286 = arith.addf %284, %285 : vector<10x8xf32>
    %c0_79 = arith.constant 0 : index
    %c0_80 = arith.constant 0 : index
    %287 = vector.load %arg4[%c0_79, %c0_80] : memref<10x8xf32, #tpu.memory_space<vmem>>, vector<10x8xf32>
    tpu.vector_store %arg4[%c0_79, %c0_80], %286 {strides = array<i32>} : memref<10x8xf32, #tpu.memory_space<vmem>>, vector<10x8xf32>,
    return
  }
}

</mosaic_0001>

<bundles_post_ra>
// kernel: tpu_custom_call.1
= control target key start
LH: loop header
LB: loop body
LE: loop exit
PB: predicated region body
PF: predicated region fallthrough
CT: control target
= control target key end

     0   :  { %9 = vsyncpa [#allocation4], 0  ;;  %s940_s18 = smov [#allocation3]   ;;  %s941_s20 = smov 64   ;;  %s1126_s0 = inlined_call_operand.vmem [shape: f32[2,128], index: 0, kind: input, shape index: {}]   ;;  %s1127_s1 = inlined_call_operand.vmem [shape: bf16[32,128], index: 1, kind: input, shape index: {}]   ;;  %s1128_s2 = inlined_call_operand.hbm [shape: bf16[32,80], index: 2, kind: input, shape index: {}]   ;;  %s1129_s3 = inlined_call_operand.vmem [shape: f32[10,8], index: 3, kind: input, shape index: {}]   ;;  %s1130_s4 = inlined_call_operand.vmem [shape: f32[10,8], index: 4, kind: output, shape index: {}]  }
   0x1   :  { %s18_s17 = sshll.u32 %s1128_s2, 4  ;;  %s20_s19 = sshll.u32 %s940_s18, 4  ;;  %s19_s17 = int_to_ptr.hbm [resolvable:$true] %s18_s17  ;;  %s21_s19 = int_to_ptr.vmem [resolvable:$true] %s20_s19 }
   0x2   :  { %s942_s21 = smov 4  }
   0x3   :  { %26 = dma.hbm_to_vmem [thread:$0]  %s19_s17, 256, %s21_s19, [#allocation4], %s941_s20, %s941_s20, %s942_s21  }
   0x4   :  { %938 = dma.done.wait [#allocation4], 256  }
   0x5   :  { %939 = vsyncadd [#allocation4], 4294967040  ;;  %v845_v0 = vld [vmem:[%s1127_s1 + $0x8] sm:$0xff]  ;;  %v844_v1 = vld [vmem:[%s1127_s1] sm:$0xff]  ;;  %v943_v2 = vmov 0   ;;  %vm56_vm0 = vcmask 261120  }
   0x6   :  { %66 = vmatpush.bf16.msra.mxu0 %v845_v0  ;;  %116 = vmatpush.bf16.msra.mxu1 %v845_v0  ;;  %v985_v3 = vld [vmem:[%s1126_s0] sm:$0x3]  ;;  %s944_s0 = smov 32   ;;  %vm100_vm1 = vcmask 253952  }
   0x7   :  { %166 = vmatpush.bf16.msra.mxu2 %v845_v0  ;;  %216 = vmatpush.bf16.msra.mxu3 %v845_v0  ;;  %v39_v4 = vmul.f32 0.0, %v985_v3  ;;  %v989_v5 = vrot.slane %v985_v3, 1  ;;  %v151_v44 = vmul.f32 2.0, %v985_v3 }
   0x9   :  { %v43_v6 = vadd.f32 %v989_v5, %v39_v4  ;;  %v102_v25 = vadd.f32 %v989_v5, %v985_v3  ;;  %v152_v45 = vadd.f32 %v151_v44, %v989_v5  ;;  %v301_v44 = vmul.f32 5.0, %v985_v3 }
   0xa   :  { %67 = vmatpush.bf16.msra.mxu0 %v844_v1  ;;  %117 = vmatpush.bf16.msra.mxu1 %v844_v1 }
   0xb   :  { %167 = vmatpush.bf16.msra.mxu2 %v844_v1  ;;  %217 = vmatpush.bf16.msra.mxu3 %v844_v1 }
   0xd   :  { %68 = vmatmul.bf16.vlgmr.msra.gmra.mxu0 %v943_v2 }
   0xe   :  { %266 = vmatpush.bf16.msrb.mxu0 %v845_v0  ;;  %316 = vmatpush.bf16.msrb.mxu1 %v845_v0 }
   0xf   :  { %366 = vmatpush.bf16.msrb.mxu2 %v845_v0  ;;  %416 = vmatpush.bf16.msrb.mxu3 %v845_v0 }
  0x12   :  { %267 = vmatpush.bf16.msrb.mxu0 %v844_v1  ;;  %317 = vmatpush.bf16.msrb.mxu1 %v844_v1 }
  0x13   :  { %367 = vmatpush.bf16.msrb.mxu2 %v844_v1  ;;  %417 = vmatpush.bf16.msrb.mxu3 %v844_v1 }
  0x16   :  { %466 = vmatpush.bf16.msra.mxu0 %v845_v0 }
  0x1a   :  { %467 = vmatpush.bf16.msra.mxu0 %v844_v1 }
  0x8a   :  { %v69_v7 = vpop.f32.mrf.mxu0 }
  0x8b   :  { %v73_v8 = vadd.f32 %v69_v7, %v43_v6 }
  0x8d   :  { %854 = vtanh.f32 %v73_v8  ;;  %v74_v11 = vmul.f32 0.5, %v73_v8 }
  0x8f   :  { %856 = vtanh.f32 %v74_v11 }
  0x92   :  { %v71_v9 = vpop.f32.mrf.mxu0 }
  0x93   :  { %v855_v10 = vpop.eup %854 }
  0x94   :  { %81 = vrot.lane.b32.xlu0 %v855_v10, %s941_s20 }
  0x95   :  { %v857_v12 = vpop.eup %856 }
  0x96   :  { %v76_v13 = vadd.f32 1.0, %v857_v12 }
  0x98   :  { %v77_v14 = vmul.f32 0.5, %v76_v13 }
  0x9a   :  { %v79_v17 = vmul.f32 0.0, %v77_v14 }
 0x106   :  { %v82_v15 = vpop.permute.xlu0 %81 }
 0x107   :  { %v84_v16 = vmul.f32 %v82_v15, %v77_v14 }
 0x109   :  { %86 = vrot.lane.b32.xlu0 %v84_v16, %s944_s0 }
 0x17b   :  { %v87_v18 = vpop.permute.xlu0 %86 }
 0x17c   :  { %v89_v19 = vadd.f32 %v87_v18, %v79_v17 }
 0x17e   :  { %858 = vtanh.f32 %v89_v19 }
 0x184   :  { %v859_v20 = vpop.eup %858 }
 0x185   :  { %92 = vrot.lane.b32.xlu1 %v859_v20, %s941_s20 }
 0x1f7   :  { %v93_v21 = vpop.permute.xlu1 %92 }
 0x1f8   :  { %v995_v22 = vmul.f32 %v93_v21, %v77_v14 }
 0x1fa   :  { %v103_v23 = vpack.c.bf16 %v995_v22, %v995_v22 }
 0x1fc   :  { %105 = vrot.lane.b32.xlu1 %v103_v23, %s944_s0  ;;  %v251_v23 = vmul.f32 4.0, %v985_v3 }
 0x26e   :  { %v106_v24 = vpop.permute.xlu1 %105 }
 0x26f   :  { %805 = vmatmul.msk.bf16.vlgmr.msra.gmra.mxu1 %vm56_vm0, %v106_v24  ;;  %v252_v24 = vadd.f32 %v251_v23, %v989_v5 }
 0x270   :  { %516 = vmatpush.bf16.msra.mxu1 %v845_v0  ;;  %v201_v0 = vmul.f32 3.0, %v985_v3 }
 0x274   :  { %517 = vmatpush.bf16.msra.mxu1 %v844_v1  ;;  %v202_v1 = vadd.f32 %v201_v0, %v989_v5 }
 0x2ec   :  { %v119_v26 = vpop.f32.mrf.mxu1 }
 0x2ed   :  { %v123_v27 = vadd.f32 %v119_v26, %v102_v25 }
 0x2ef   :  { %860 = vtanh.f32 %v123_v27  ;;  %v124_v30 = vmul.f32 0.5, %v123_v27 }
 0x2f1   :  { %862 = vtanh.f32 %v124_v30 }
 0x2f4   :  { %v121_v28 = vpop.f32.mrf.mxu1 }
 0x2f5   :  { %v861_v29 = vpop.eup %860 }
 0x2f6   :  { %131 = vrot.lane.b32.xlu2 %v861_v29, %s941_s20 }
 0x2f7   :  { %v863_v31 = vpop.eup %862 }
 0x2f8   :  { %v126_v32 = vadd.f32 1.0, %v863_v31 }
 0x2fa   :  { %v127_v33 = vmul.f32 0.5, %v126_v32 }
 0x2fc   :  { %v129_v36 = vmul.f32 %v127_v33, %v89_v19 }
 0x350   :  { %v132_v34 = vpop.permute.xlu2 %131 }
 0x351   :  { %v134_v35 = vmul.f32 %v132_v34, %v127_v33 }
 0x353   :  { %136 = vrot.lane.b32.xlu2 %v134_v35, %s944_s0 }
 0x3ad   :  { %v137_v37 = vpop.permute.xlu2 %136 }
 0x3ae   :  { %v139_v38 = vadd.f32 %v137_v37, %v129_v36 }
 0x3b0   :  { %864 = vtanh.f32 %v139_v38 }
 0x3b6   :  { %v865_v39 = vpop.eup %864 }
 0x3b7   :  { %142 = vrot.lane.b32.xlu0 %v865_v39, %s941_s20 }
 0x429   :  { %v143_v40 = vpop.permute.xlu0 %142 }
 0x42a   :  { %v1006_v41 = vmul.f32 %v143_v40, %v127_v33 }
 0x42c   :  { %v153_v42 = vpack.c.bf16 %v1006_v41, %v1006_v41 }
 0x42e   :  { %155 = vrot.lane.b32.xlu1 %v153_v42, %s944_s0 }
 0x4a0   :  { %v156_v43 = vpop.permute.xlu1 %155 }
 0x4a1   :  { %806 = vmatmul.msk.bf16.vlgmr.msra.gmra.mxu2 %vm56_vm0, %v156_v43 }
 0x524   :  { %v169_v46 = vpop.f32.mrf.mxu2 }
 0x525   :  { %v173_v47 = vadd.f32 %v169_v46, %v152_v45  ;;  %v302_v45 = vadd.f32 %v301_v44, %v989_v5 }
 0x527   :  { %866 = vtanh.f32 %v173_v47  ;;  %v174_v50 = vmul.f32 0.5, %v173_v47 }
 0x529   :  { %868 = vtanh.f32 %v174_v50 }
 0x52c   :  { %v171_v48 = vpop.f32.mrf.mxu2 }
 0x52d   :  { %v867_v49 = vpop.eup %866 }
 0x52e   :  { %181 = vrot.lane.b32.xlu2 %v867_v49, %s941_s20 }
 0x52f   :  { %v869_v51 = vpop.eup %868 }
 0x530   :  { %v176_v52 = vadd.f32 1.0, %v869_v51 }
 0x532   :  { %v177_v53 = vmul.f32 0.5, %v176_v52 }
 0x534   :  { %v179_v56 = vmul.f32 %v177_v53, %v139_v38 }
 0x588   :  { %v182_v54 = vpop.permute.xlu2 %181 }
 0x589   :  { %v184_v55 = vmul.f32 %v182_v54, %v177_v53 }
 0x58b   :  { %186 = vrot.lane.b32.xlu0 %v184_v55, %s944_s0 }
 0x5fd   :  { %v187_v57 = vpop.permute.xlu0 %186 }
 0x5fe   :  { %v189_v58 = vadd.f32 %v187_v57, %v179_v56 }
 0x600   :  { %870 = vtanh.f32 %v189_v58 }
 0x606   :  { %v871_v59 = vpop.eup %870 }
 0x607   :  { %192 = vrot.lane.b32.xlu1 %v871_v59, %s941_s20 }
 0x679   :  { %v193_v60 = vpop.permute.xlu1 %192 }
 0x67a   :  { %v1017_v61 = vmul.f32 %v193_v60, %v177_v53 }
 0x67c   :  { %v203_v62 = vpack.c.bf16 %v1017_v61, %v1017_v61 }
 0x67e   :  { %205 = vrot.lane.b32.xlu2 %v203_v62, %s944_s0 }
 0x6d8   :  { %v206_v63 = vpop.permute.xlu2 %205 }
 0x6d9   :  { %807 = vmatmul.msk.bf16.vlgmr.msra.gmra.mxu3 %vm56_vm0, %v206_v63 }
 0x75c   :  { %v219_v2 = vpop.f32.mrf.mxu3 }
 0x75d   :  { %v223_v4 = vadd.f32 %v219_v2, %v202_v1  ;;  %v351_v1 = vmul.f32 6.0, %v985_v3 }
 0x75f   :  { %872 = vtanh.f32 %v223_v4  ;;  %v224_v8 = vmul.f32 0.5, %v223_v4  ;;  %v352_v2 = vadd.f32 %v351_v1, %v989_v5 }
 0x761   :  { %874 = vtanh.f32 %v224_v8 }
 0x764   :  { %v221_v6 = vpop.f32.mrf.mxu3 }
 0x765   :  { %v873_v7 = vpop.eup %872 }
 0x766   :  { %231 = vrot.lane.b32.xlu0 %v873_v7, %s941_s20 }
 0x767   :  { %v875_v9 = vpop.eup %874 }
 0x768   :  { %v226_v10 = vadd.f32 1.0, %v875_v9 }
 0x76a   :  { %v227_v11 = vmul.f32 0.5, %v226_v10 }
 0x76c   :  { %v229_v14 = vmul.f32 %v227_v11, %v189_v58 }
 0x7d8   :  { %v232_v12 = vpop.permute.xlu0 %231 }
 0x7d9   :  { %v234_v13 = vmul.f32 %v232_v12, %v227_v11 }
 0x7db   :  { %236 = vrot.lane.b32.xlu1 %v234_v13, %s944_s0 }
 0x84d   :  { %v237_v15 = vpop.permute.xlu1 %236 }
 0x84e   :  { %v239_v16 = vadd.f32 %v237_v15, %v229_v14 }
 0x850   :  { %876 = vtanh.f32 %v239_v16 }
 0x856   :  { %v877_v17 = vpop.eup %876 }
 0x857   :  { %242 = vrot.lane.b32.xlu2 %v877_v17, %s941_s20 }
 0x8b1   :  { %v243_v18 = vpop.permute.xlu2 %242 }
 0x8b2   :  { %v1028_v19 = vmul.f32 %v243_v18, %v227_v11 }
 0x8b4   :  { %v253_v20 = vpack.c.bf16 %v1028_v19, %v1028_v19 }
 0x8b6   :  { %255 = vrot.lane.b32.xlu0 %v253_v20, %s944_s0 }
 0x928   :  { %v256_v21 = vpop.permute.xlu0 %255 }
 0x929   :  { %808 = vmatmul.msk.bf16.vlgmr.msrb.gmra.mxu0 %vm56_vm0, %v256_v21 }
 0x9a6   :  { %v269_v25 = vpop.f32.mrf.mxu0 }
 0x9a7   :  { %v273_v26 = vadd.f32 %v269_v25, %v252_v24  ;;  %v401_v25 = vmul.f32 7.0, %v985_v3 }
 0x9a9   :  { %878 = vtanh.f32 %v273_v26  ;;  %v274_v29 = vmul.f32 0.5, %v273_v26  ;;  %v402_v26 = vadd.f32 %v401_v25, %v989_v5  ;;  %v847_v25 = vld [vmem:[#allocation3 + $0x8] sm:$0xff] }
 0x9aa   :  { %579 = vmatpush.bf16.msra.mxu2 %v847_v25 }
 0x9ab   :  { %880 = vtanh.f32 %v274_v29 }
 0x9ae   :  { %v271_v27 = vpop.f32.mrf.mxu0 }
 0x9af   :  { %v879_v28 = vpop.eup %878 }
 0x9b0   :  { %281 = vrot.lane.b32.xlu1 %v879_v28, %s941_s20 }
 0x9b1   :  { %v881_v30 = vpop.eup %880 }
 0x9b2   :  { %v276_v31 = vadd.f32 1.0, %v881_v30 }
 0x9b4   :  { %v277_v32 = vmul.f32 0.5, %v276_v31 }
 0x9b6   :  { %v279_v35 = vmul.f32 %v277_v32, %v239_v16 }
 0xa22   :  { %v282_v33 = vpop.permute.xlu1 %281 }
 0xa23   :  { %v284_v34 = vmul.f32 %v282_v33, %v277_v32 }
 0xa25   :  { %286 = vrot.lane.b32.xlu2 %v284_v34, %s944_s0 }
 0xa7f   :  { %v287_v36 = vpop.permute.xlu2 %286 }
 0xa80   :  { %v289_v37 = vadd.f32 %v287_v36, %v279_v35 }
 0xa82   :  { %882 = vtanh.f32 %v289_v37 }
 0xa88   :  { %v883_v38 = vpop.eup %882 }
 0xa89   :  { %292 = vrot.lane.b32.xlu0 %v883_v38, %s941_s20 }
 0xafb   :  { %v293_v39 = vpop.permute.xlu0 %292 }
 0xafc   :  { %v1039_v40 = vmul.f32 %v293_v39, %v277_v32 }
 0xafe   :  { %v303_v42 = vpack.c.bf16 %v1039_v40, %v1039_v40 }
 0xb00   :  { %305 = vrot.lane.b32.xlu1 %v303_v42, %s944_s0 }
 0xb72   :  { %v306_v43 = vpop.permute.xlu1 %305 }
 0xb73   :  { %809 = vmatmul.msk.bf16.vlgmr.msrb.gmra.mxu1 %vm56_vm0, %v306_v43 }
 0xbf0   :  { %v319_v46 = vpop.f32.mrf.mxu1 }
 0xbf1   :  { %v323_v47 = vadd.f32 %v319_v46, %v302_v45 }
 0xbf3   :  { %884 = vtanh.f32 %v323_v47  ;;  %v324_v50 = vmul.f32 0.5, %v323_v47  ;;  %v451_v47 = vmul.f32 8.0, %v985_v3 }
 0xbf5   :  { %886 = vtanh.f32 %v324_v50 }
 0xbf8   :  { %v321_v48 = vpop.f32.mrf.mxu1 }
 0xbf9   :  { %v885_v49 = vpop.eup %884  ;;  %v452_v48 = vadd.f32 %v451_v47, %v989_v5 }
 0xbfa   :  { %331 = vrot.lane.b32.xlu2 %v885_v49, %s941_s20 }
 0xbfb   :  { %v887_v51 = vpop.eup %886 }
 0xbfc   :  { %v326_v52 = vadd.f32 1.0, %v887_v51 }
 0xbfe   :  { %v327_v53 = vmul.f32 0.5, %v326_v52 }
 0xc00   :  { %v329_v56 = vmul.f32 %v327_v53, %v289_v37 }
 0xc54   :  { %v332_v54 = vpop.permute.xlu2 %331 }
 0xc55   :  { %v334_v55 = vmul.f32 %v332_v54, %v327_v53 }
 0xc57   :  { %336 = vrot.lane.b32.xlu0 %v334_v55, %s944_s0 }
 0xcc9   :  { %v337_v57 = vpop.permute.xlu0 %336 }
 0xcca   :  { %v339_v58 = vadd.f32 %v337_v57, %v329_v56 }
 0xccc   :  { %888 = vtanh.f32 %v339_v58 }
 0xcd2   :  { %v889_v59 = vpop.eup %888 }
 0xcd3   :  { %342 = vrot.lane.b32.xlu1 %v889_v59, %s941_s20 }
 0xd45   :  { %v343_v60 = vpop.permute.xlu1 %342 }
 0xd46   :  { %v1050_v62 = vmul.f32 %v343_v60, %v327_v53 }
 0xd48   :  { %v353_v63 = vpack.c.bf16 %v1050_v62, %v1050_v62 }
 0xd4a   :  { %355 = vrot.lane.b32.xlu2 %v353_v63, %s944_s0 }
 0xda4   :  { %v356_v0 = vpop.permute.xlu2 %355 }
 0xda5   :  { %810 = vmatmul.msk.bf16.vlgmr.msrb.gmra.mxu2 %vm56_vm0, %v356_v0 }
 0xe28   :  { %v369_v4 = vpop.f32.mrf.mxu2 }
 0xe29   :  { %v373_v6 = vadd.f32 %v369_v4, %v352_v2 }
 0xe2b   :  { %890 = vtanh.f32 %v373_v6  ;;  %v374_v9 = vmul.f32 0.5, %v373_v6 }
 0xe2d   :  { %892 = vtanh.f32 %v374_v9 }
 0xe30   :  { %v371_v7 = vpop.f32.mrf.mxu2 }
 0xe31   :  { %v891_v8 = vpop.eup %890  ;;  %v501_v7 = vmul.f32 9.0, %v985_v3 }
 0xe32   :  { %381 = vrot.lane.b32.xlu0 %v891_v8, %s941_s20 }
 0xe33   :  { %v893_v10 = vpop.eup %892  ;;  %v502_v8 = vadd.f32 %v501_v7, %v989_v5 }
 0xe34   :  { %v376_v11 = vadd.f32 1.0, %v893_v10 }
 0xe36   :  { %v377_v12 = vmul.f32 0.5, %v376_v11 }
 0xe38   :  { %v379_v15 = vmul.f32 %v377_v12, %v339_v58 }
 0xea4   :  { %v382_v13 = vpop.permute.xlu0 %381 }
 0xea5   :  { %v384_v14 = vmul.f32 %v382_v13, %v377_v12 }
 0xea7   :  { %386 = vrot.lane.b32.xlu1 %v384_v14, %s944_s0 }
 0xf19   :  { %v387_v16 = vpop.permute.xlu1 %386 }
 0xf1a   :  { %v389_v17 = vadd.f32 %v387_v16, %v379_v15 }
 0xf1c   :  { %894 = vtanh.f32 %v389_v17 }
 0xf22   :  { %v895_v18 = vpop.eup %894 }
 0xf23   :  { %392 = vrot.lane.b32.xlu2 %v895_v18, %s941_s20 }
 0xf7d   :  { %v393_v20 = vpop.permute.xlu2 %392 }
 0xf7e   :  { %v1061_v21 = vmul.f32 %v393_v20, %v377_v12 }
 0xf80   :  { %v403_v23 = vpack.c.bf16 %v1061_v21, %v1061_v21 }
 0xf82   :  { %405 = vrot.lane.b32.xlu0 %v403_v23, %s944_s0 }
 0xff4   :  { %v406_v24 = vpop.permute.xlu0 %405 }
 0xff5   :  { %811 = vmatmul.msk.bf16.vlgmr.msrb.gmra.mxu3 %vm56_vm0, %v406_v24 }
0x1078   :  { %v419_v27 = vpop.f32.mrf.mxu3 }
0x1079   :  { %v423_v28 = vadd.f32 %v419_v27, %v402_v26 }
0x107b   :  { %896 = vtanh.f32 %v423_v28  ;;  %v424_v31 = vmul.f32 0.5, %v423_v28 }
0x107d   :  { %898 = vtanh.f32 %v424_v31 }
0x1080   :  { %v421_v29 = vpop.f32.mrf.mxu3 }
0x1081   :  { %v897_v30 = vpop.eup %896 }
0x1082   :  { %431 = vrot.lane.b32.xlu1 %v897_v30, %s941_s20  ;;  %v846_v30 = vld [vmem:[#allocation3] sm:$0xff] }
0x1083   :  { %v899_v32 = vpop.eup %898  ;;  %580 = vmatpush.bf16.msra.mxu2 %v846_v30 }
0x1084   :  { %v426_v33 = vadd.f32 1.0, %v899_v32 }
0x1086   :  { %v427_v34 = vmul.f32 0.5, %v426_v33 }
0x1088   :  { %v429_v37 = vmul.f32 %v427_v34, %v389_v17 }
0x10f4   :  { %v432_v35 = vpop.permute.xlu1 %431 }
0x10f5   :  { %v434_v36 = vmul.f32 %v432_v35, %v427_v34 }
0x10f7   :  { %436 = vrot.lane.b32.xlu2 %v434_v36, %s944_s0 }
0x1151   :  { %v437_v38 = vpop.permute.xlu2 %436 }
0x1152   :  { %v439_v39 = vadd.f32 %v437_v38, %v429_v37 }
0x1154   :  { %900 = vtanh.f32 %v439_v39 }
0x115a   :  { %v901_v42 = vpop.eup %900 }
0x115b   :  { %442 = vrot.lane.b32.xlu0 %v901_v42, %s941_s20 }
0x11cd   :  { %v443_v43 = vpop.permute.xlu0 %442 }
0x11ce   :  { %v445_v44 = vmul.f32 %v443_v43, %v427_v34  ;;  %v945_v43 = vmov 1.0|1.0  }
0x11d0   :  { %v453_v45 = vpack.c.bf16 %v445_v44, %v445_v44 }
0x11d2   :  { %455 = vrot.lane.b32.xlu1 %v453_v45, %s944_s0 }
0x1244   :  { %v456_v46 = vpop.permute.xlu1 %455 }
0x1245   :  { %812 = vmatmul.msk.bf16.vlgmr.msra.gmra.mxu0 %vm56_vm0, %v456_v46 }
0x12c2   :  { %v469_v49 = vpop.f32.mrf.mxu0 }
0x12c3   :  { %v473_v50 = vadd.f32 %v469_v49, %v452_v48 }
0x12c5   :  { %902 = vtanh.f32 %v473_v50  ;;  %v474_v53 = vmul.f32 0.5, %v473_v50 }
0x12c7   :  { %904 = vtanh.f32 %v474_v53 }
0x12ca   :  { %v471_v51 = vpop.f32.mrf.mxu0 }
0x12cb   :  { %v903_v52 = vpop.eup %902 }
0x12cc   :  { %481 = vrot.lane.b32.xlu2 %v903_v52, %s941_s20 }
0x12cd   :  { %v905_v54 = vpop.eup %904 }
0x12ce   :  { %v476_v55 = vadd.f32 1.0, %v905_v54 }
0x12d0   :  { %v477_v56 = vmul.f32 0.5, %v476_v55 }
0x12d2   :  { %v479_v59 = vmul.f32 %v477_v56, %v439_v39 }
0x1326   :  { %v482_v57 = vpop.permute.xlu2 %481 }
0x1327   :  { %v484_v58 = vmul.f32 %v482_v57, %v477_v56 }
0x1329   :  { %486 = vrot.lane.b32.xlu0 %v484_v58, %s944_s0 }
0x139b   :  { %v487_v60 = vpop.permute.xlu0 %486 }
0x139c   :  { %v489_v63 = vadd.f32 %v487_v60, %v479_v59 }
0x139e   :  { %906 = vtanh.f32 %v489_v63 }
0x13a4   :  { %v907_v0 = vpop.eup %906 }
0x13a5   :  { %492 = vrot.lane.b32.xlu1 %v907_v0, %s941_s20 }
0x1417   :  { %v493_v1 = vpop.permute.xlu1 %492 }
0x1418   :  { %v495_v2 = vmul.f32 %v493_v1, %v477_v56 }
0x141a   :  { %v503_v4 = vpack.c.bf16 %v495_v2, %v495_v2 }
0x141c   :  { %505 = vrot.lane.b32.xlu2 %v503_v4, %s944_s0 }
0x1476   :  { %v506_v6 = vpop.permute.xlu2 %505 }
0x1477   :  { %813 = vmatmul.msk.bf16.vlgmr.msra.gmra.mxu1 %vm56_vm0, %v506_v6 }
0x14f4   :  { %v519_v9 = vpop.f32.mrf.mxu1 }
0x14f5   :  { %v523_v10 = vadd.f32 %v519_v9, %v502_v8  ;;  %v768_v8 = vld [vmem:[%s1129_s3] sm:$0xff] }
0x14f7   :  { %908 = vtanh.f32 %v523_v10  ;;  %v524_v13 = vmul.f32 0.5, %v523_v10 }
0x14f9   :  { %910 = vtanh.f32 %v524_v13 }
0x14fc   :  { %v521_v11 = vpop.f32.mrf.mxu1 }
0x14fd   :  { %v909_v12 = vpop.eup %908  ;;  %v769_v11 = vld [vmem:[%s1129_s3 + $0x8] sm:$0x3] }
0x14fe   :  { %531 = vrot.lane.b32.xlu0 %v909_v12, %s941_s20 }
0x14ff   :  { %v911_v3 = vpop.eup %910 }
0x1500   :  { %v526_v5 = vadd.f32 1.0, %v911_v3 }
0x1502   :  { %v527_v14 = vmul.f32 0.5, %v526_v5 }
0x1504   :  { %v529_v18 = vmul.f32 %v527_v14, %v489_v63 }
0x1506   :  { %97 = vrot.lane.b32.xlu0 %v995_v22, %s944_s0 }
0x150e   :  { %247 = vrot.lane.b32.xlu0 %v1028_v19, %s944_s0 }
0x1516   :  { %397 = vrot.lane.b32.xlu0 %v1061_v21, %s944_s0 }
0x1570   :  { %v532_v15 = vpop.permute.xlu0 %531 }
0x1571   :  { %v534_v16 = vmul.f32 %v532_v15, %v527_v14 }
0x1573   :  { %536 = vrot.lane.b32.xlu1 %v534_v16, %s944_s0 }
0x1578   :  { %v98_v17 = vpop.permute.xlu0 %97 }
0x1579   :  { %101 = vst.msk [vmem:[#allocation2] sm:$0x1] %vm100_vm1, %v98_v17 }
0x157b   :  { %147 = vrot.lane.b32.xlu1 %v1006_v41, %s944_s0 }
0x1580   :  { %v248_v22 = vpop.permute.xlu0 %247 }
0x1581   :  { %250 = vst.msk [vmem:[#allocation2 + $0x3] sm:$0x1] %vm100_vm1, %v248_v22 }
0x1583   :  { %297 = vrot.lane.b32.xlu1 %v1039_v40, %s944_s0 }
0x1588   :  { %v398_v19 = vpop.permute.xlu0 %397 }
0x1589   :  { %400 = vst.msk [vmem:[#allocation2 + $0x6] sm:$0x1] %vm100_vm1, %v398_v19 }
0x158b   :  { %447 = vrot.lane.b32.xlu1 %v445_v44, %s944_s0 }
0x15e5   :  { %v537_v20 = vpop.permute.xlu1 %536 }
0x15e6   :  { %v539_v21 = vadd.f32 %v537_v20, %v529_v18 }
0x15e8   :  { %912 = vtanh.f32 %v539_v21 }
0x15ed   :  { %v148_v23 = vpop.permute.xlu1 %147 }
0x15ee   :  { %v913_v24 = vpop.eup %912  ;;  %150 = vst.msk [vmem:[#allocation2 + $0x1] sm:$0x1] %vm100_vm1, %v148_v23 }
0x15ef   :  { %542 = vrot.lane.b32.xlu2 %v913_v24, %s941_s20 }
0x15f5   :  { %v298_v41 = vpop.permute.xlu1 %297 }
0x15f6   :  { %300 = vst.msk [vmem:[#allocation2 + $0x4] sm:$0x1] %vm100_vm1, %v298_v41 }
0x15f7   :  { %197 = vrot.lane.b32.xlu2 %v1017_v61, %s944_s0 }
0x15fd   :  { %v448_v40 = vpop.permute.xlu1 %447 }
0x15fe   :  { %450 = vst.msk [vmem:[#allocation2 + $0x7] sm:$0x1] %vm100_vm1, %v448_v40 }
0x15ff   :  { %347 = vrot.lane.b32.xlu2 %v1050_v62, %s944_s0  ;;  %v587_v62 = vlaneseq }
0x1601   :  { %v590_v31 = vshrl.u32 %v587_v62, 7  ;;  %v588_v32 = vand.u32 127, %v587_v62 }
0x1603   :  { %v610_v33 = vadd.s32 64, %v590_v31  ;;  %v611_v34 = vadd.s32 72, %v590_v31  ;;  %v608_v35 = vadd.s32 48, %v590_v31  ;;  %v609_v36 = vadd.s32 56, %v590_v31 }
0x1604   :  { %v606_v48 = vadd.s32 32, %v590_v31  ;;  %v607_v49 = vadd.s32 40, %v590_v31  ;;  %v604_v52 = vadd.s32 16, %v590_v31  ;;  %v605_v53 = vadd.s32 24, %v590_v31 }
0x1605   :  { %v672_v37 = vand.u32 7, %v610_v33  ;;  %v679_v38 = vand.u32 7, %v611_v34  ;;  %v658_v39 = vand.u32 7, %v608_v35  ;;  %v665_v42 = vand.u32 7, %v609_v36 }
0x1606   :  { %v644_v50 = vand.u32 7, %v606_v48  ;;  %v651_v51 = vand.u32 7, %v607_v49  ;;  %v630_v54 = vand.u32 7, %v604_v52  ;;  %v637_v55 = vand.u32 7, %v605_v53 }
0x1607   :  { %497 = vrot.lane.b32.xlu2 %v495_v2, %s944_s0  ;;  %vm740_vm2 = vcmp.eq.s32.totalorder %v672_v37, %v588_v32  ;;  %vm741_vm3 = vcmp.eq.s32.totalorder %v679_v38, %v588_v32  ;;  %vm738_vm4 = vcmp.eq.s32.totalorder %v658_v39, %v588_v32  ;;  %vm739_vm5 = vcmp.eq.s32.totalorder %v665_v42, %v588_v32 }
0x1608   :  { %vm833_vm6 = vmpackc.low %vm741_vm3, %vm740_vm2  ;;  %vm736_vm8 = vcmp.eq.s32.totalorder %v644_v50, %v588_v32  ;;  %vm737_vm9 = vcmp.eq.s32.totalorder %v651_v51, %v588_v32  ;;  %v591_v56 = vadd.s32 8, %v590_v31  ;;  %vm734_vm11 = vcmp.eq.s32.totalorder %v630_v54, %v588_v32 }
0x1609   :  { %834 = vmatpush.bf16.msk.msra.mxu3 %vm833_vm6, %v945_v43  ;;  %vm835_vm7 = vmpackc.low %vm739_vm5, %vm738_vm4  ;;  %vm735_vm12 = vcmp.eq.s32.totalorder %v637_v55, %v588_v32  ;;  %v616_v57 = vand.u32 7, %v590_v31  ;;  %v592_v59 = vmul.u32 8, %v590_v31 }
0x160a   :  { %vm837_vm10 = vmpackc.low %vm737_vm9, %vm736_vm8  ;;  %v623_v58 = vand.u32 7, %v591_v56  ;;  %v593_v60 = vmul.u32 8, %v591_v56  ;;  %vm788_vm8 = vcmask 64512   ;;  %vm790_vm9 = vcmask 58368  }
0x160b   :  { %vm839_vm13 = vmpackc.low %vm735_vm12, %vm734_vm11  ;;  %vm732_vm14 = vcmp.eq.s32.totalorder %v616_v57, %v588_v32  ;;  %v596_v63 = vadd.s32 8, %v592_v59 }
0x160c   :  { %vm733_vm15 = vcmp.eq.s32.totalorder %v623_v58, %v588_v32  ;;  %v597_v0 = vadd.s32 8, %v593_v60  ;;  %vm595_vm3 = vcmp.ge.s32.totalorder %v588_v32, %v593_v60 }
0x160d   :  { %836 = vmatpush.bf16.msk.msra.mxu3 %vm835_vm7, %v945_v43  ;;  %vm598_vm2 = vcmp.lt.s32.totalorder %v588_v32, %v596_v63  ;;  %vm770_vm7 = vcmask 654336  }
0x160e   :  { %vm599_vm4 = vcmp.lt.s32.totalorder %v588_v32, %v597_v0 }
0x160f   :  { %vm601_vm6 = vmand %vm595_vm3, %vm599_vm4 }
0x1611   :  { %838 = vmatpush.bf16.msk.msra.mxu3 %vm837_vm10, %v945_v43 }
0x1615   :  { %840 = vmatpush.bf16.msk.msra.mxu3 %vm839_vm13, %v945_v43 }
0x1649   :  { %v543_v26 = vpop.permute.xlu2 %542 }
0x164a   :  { %v545_v27 = vmul.f32 %v543_v26, %v527_v14 }
0x164c   :  { %547 = vrot.lane.b32.xlu0 %v545_v27, %s944_s0 }
0x1651   :  { %v198_v28 = vpop.permute.xlu2 %197 }
0x1652   :  { %200 = vst.msk [vmem:[#allocation2 + $0x2] sm:$0x1] %vm100_vm1, %v198_v28 }
0x1659   :  { %v348_v29 = vpop.permute.xlu2 %347 }
0x165a   :  { %350 = vst.msk [vmem:[#allocation2 + $0x5] sm:$0x1] %vm100_vm1, %v348_v29 }
0x1661   :  { %v498_v61 = vpop.permute.xlu2 %497  ;;  %v551_v45 = vld [vmem:[#allocation2] sm:$0xff] }
0x1662   :  { %500 = vst.msk [vmem:[#allocation2 + $0x8] sm:$0x1] %vm100_vm1, %v498_v61 }
0x16be   :  { %v548_v44 = vpop.permute.xlu0 %547 }
0x16bf   :  { %550 = vst.msk [vmem:[#allocation2 + $0x9] sm:$0x1] %vm100_vm1, %v548_v44  ;;  %vm594_vm1 = vcmp.ge.s32.totalorder %v588_v32, %v592_v59 }
0x16c0   :  { %vm600_vm5 = vmand %vm594_vm1, %vm598_vm2 }
0x16c6   :  { %v552_v46 = vld [vmem:[#allocation2 + $0x8] sm:$0x3] }
0x16c7   :  { %v553_v47 = vpack.c.bf16 %v552_v46, %v551_v45 }
0x16c9   :  { %822 = vmatmul.msk.bf16.vlgmr.msra.gmra.mxu2 %vm56_vm0, %v553_v47  ;;  %vm841_vm0 = vmpackc.low %vm733_vm15, %vm732_vm14 }
0x16ca   :  { %842 = vmatpush.bf16.msk.msra.mxu3 %vm841_vm0, %v945_v43 }
0x174c   :  { %v582_v1 = vpop.f32.mrf.mxu2 }
0x174d   :  { %v602_v4 = vsel %vm600_vm5, %v582_v1, 0.0 }
0x1754   :  { %v584_v2 = vpop.f32.mrf.mxu2 }
0x1755   :  { %v603_v6 = vsel %vm601_vm6, %v584_v2, 0.0 }
0x1756   :  { %v767_v7 = vpack.c.bf16 %v603_v6, %v602_v4 }
0x1758   :  { %843 = vmatmul.msk.bf16.vlgmr.msra.gmra.mxu3 %vm770_vm7, %v767_v7 }
0x17db   :  { %v783_v9 = vpop.f32.mrf.mxu3 }
0x17dc   :  { %v784_v10 = vadd.f32 %v783_v9, %v768_v8 }
0x17de   :  { %789 = vst.msk [vmem:[%s1130_s4] sm:$0xff] %vm788_vm8, %v784_v10 }
0x17e3   :  { %v785_v12 = vpop.f32.mrf.mxu3 }
0x17e4   :  { %v786_v13 = vadd.f32 %v785_v12, %v769_v11 }
0x17e6   :  { %791 = vst.msk [vmem:[%s1130_s4 + $0x8] sm:$0x3] %vm790_vm9, %v786_v13 }
0x17e7   :  { %796 = vsyncpa [#allocation4], 1 }

</bundles_post_ra>
